<compile_context>
chip_gen: v6e
topology: v6e:2x2x1
jax: 0.10.0
libtpu: 0.0.40
codegen_flags: <defaults>
</compile_context>

<pallas_src>
import jax
import jax.numpy as jnp
from jax.experimental import pallas as pl
from jax.experimental.pallas import tpu as pltpu


def actor_kernel(x_ref,
                 w1_ref, b1_ref,
                 w2_ref, b2_ref,
                 w3_ref, b3_ref,
                 w4_ref, b4_ref,
                 w5_ref, b5_ref,
                 o_ref):
    """5-layer MLP (Linear+ReLU x4, final Linear) on one batch tile.

    x_ref is batch-major [tile, state_dim]; everything after the first layer is
    feature-major [features, tile] so the batch stays on the 128-lane axis.
    """
    cdt = w1_ref.dtype  # MXU operand dtype (bf16 on the fast path, f32 otherwise)

    # Layer 1: fold the input transpose into the contraction (w1 @ x.T).
    h = jax.lax.dot_general(
        w1_ref[...], x_ref[...].astype(cdt),
        dimension_numbers=(((1,), (1,)), ((), ())),
        preferred_element_type=jnp.float32)                       # [2h, tile] f32
    h = jnp.maximum(h + b1_ref[...], 0.0)

    h = jnp.dot(w2_ref[...], h.astype(cdt), preferred_element_type=jnp.float32)
    h = jnp.maximum(h + b2_ref[...], 0.0)

    h = jnp.dot(w3_ref[...], h.astype(cdt), preferred_element_type=jnp.float32)
    h = jnp.maximum(h + b3_ref[...], 0.0)

    h = jnp.dot(w4_ref[...], h.astype(cdt), preferred_element_type=jnp.float32)
    h = jnp.maximum(h + b4_ref[...], 0.0)

    out = jnp.dot(w5_ref[...], h.astype(cdt), preferred_element_type=jnp.float32)
    out = out + b5_ref[...]
    o_ref[...] = out.astype(o_ref.dtype)                          # [action_dim, tile]


def _round_up(x, m):
    return ((x + m - 1) // m) * m


def _cdiv(a, b):
    return -(-a // b)


def _num_tensorcores():
    """Best-effort TensorCore count (2 on v7x megacore, 1 on v5e/v6e)."""
    try:
        info = pltpu.get_tpu_info()
        for attr in ("num_cores", "core_count", "num_tensorcores",
                     "tensorcore_count", "num_cores_per_chip"):
            v = getattr(info, attr, None)
            if v:
                return int(v)
    except Exception:
        pass
    try:
        kind = jax.devices()[0].device_kind.lower()
        if "v7" in kind:
            return 2
    except Exception:
        pass
    return 1


def actor_forward(state, params, *, batch_tile=4096, use_bf16=True):
    """state: [B, state_dim] float32.  params: list of (W[out,in], b[out,1])."""
    B, state_dim = state.shape
    action_dim = params[-1][0].shape[0]

    compute_dtype = jnp.bfloat16 if use_bf16 else jnp.float32
    weights = [w.astype(compute_dtype) for (w, _) in params]
    biases = [b.astype(jnp.float32) for (_, b) in params]

    # ---- batch tiling (batch lives on the 128-lane axis) --------------------
    b_lanes = _round_up(B, 128)
    max_tile = max(128, _round_up(min(int(batch_tile), 4096), 128))

    n_steps = max(1, _cdiv(b_lanes, max_tile))
    if _num_tensorcores() >= 2 and b_lanes > 128:
        # v7x megacore: an even number of equal-size tiles so both TensorCores
        # get the same amount of work.  Single-TC chips skip this (the grid is
        # a serial loop there, extra steps are pure overhead).
        n_steps = max(2, n_steps + (n_steps % 2))
    tile = min(max_tile, _round_up(_cdiv(b_lanes, n_steps), 128))
    B_pad = _round_up(b_lanes, tile)

    # Pad only the batch dim (no transpose, no extra HBM pass for the common
    # case where B is already tile-aligned).  Padded rows produce
    # bias-propagated garbage columns that are sliced off below.
    x = state if B_pad == B else jnp.pad(state, ((0, B_pad - B), (0, 0)))

    grid = (B_pad // tile,)

    def _resident(arr):
        # Constant index_map -> block is VMEM-resident across the grid.
        return pl.BlockSpec(arr.shape, lambda i: (0, 0))

    in_specs = [pl.BlockSpec((tile, state_dim), lambda i: (i, 0))]
    flat_params = []
    for w, b in zip(weights, biases):
        in_specs += [_resident(w), _resident(b)]
        flat_params += [w, b]

    out_spec = pl.BlockSpec((action_dim, tile), lambda i: (0, i))

    out_t = pl.pallas_call(
        actor_kernel,
        out_shape=jax.ShapeDtypeStruct((action_dim, B_pad), jnp.float32),
        grid_spec=pltpu.PrefetchScalarGridSpec(
            num_scalar_prefetch=0,
            grid=grid,
            in_specs=in_specs,
            out_specs=out_spec,
        ),
        compiler_params=pltpu.CompilerParams(
            dimension_semantics=("parallel",)),
    )(x, *flat_params)

    # Back to batch-major [B, action_dim] (cheap: 16 bytes per row).
    return out_t.T[:B]


def init_actor_params(key, state_dim, action_dim, hidden_dim=32):
    """Deterministic synthetic params matching Actor's nn.Linear layers.

    W is stored PyTorch-style as [out_features, in_features]; b as [out, 1].
    """
    dims = [state_dim, 2 * hidden_dim, hidden_dim, hidden_dim, hidden_dim, action_dim]
    params = []
    for idx in range(len(dims) - 1):
        key, wk, bk = jax.random.split(key, 3)
        fan_in, fan_out = dims[idx], dims[idx + 1]
        w = jax.random.normal(wk, (fan_out, fan_in), dtype=jnp.float32) * 0.1
        b = jax.random.normal(bk, (fan_out, 1), dtype=jnp.float32) * 0.1
        params.append((w, b))
    return params


def actor_reference(state, params):
    """Plain-JAX (batch-major, f32) reference of the same forward pass."""
    h = state
    for i, (w, b) in enumerate(params):
        h = h @ w.T + b[:, 0]
        if i < len(params) - 1:
            h = jnp.maximum(h, 0.0)
    return h


if __name__ == "__main__":
    state_dim = 16
    action_dim = 4
    hidden_dim = 32
    batch = 200   # pads to 256 lanes

    key = jax.random.PRNGKey(0)
    key, xk, pk = jax.random.split(key, 3)

    state = jax.random.normal(xk, (batch, state_dim), dtype=jnp.float32)
    params = init_actor_params(pk, state_dim, action_dim, hidden_dim)

    ref = actor_reference(state, params)

    # Structure/correctness check with f32 MXU operands (tight tolerance).
    out_f32 = jax.block_until_ready(actor_forward(state, params, use_bf16=False))
    assert out_f32.shape == (batch, action_dim)
    assert jnp.allclose(out_f32, ref, atol=1e-4, rtol=1e-4), "f32 path mismatch vs reference"

    # Fast path: bf16 MXU operands with f32 accumulation (loosened tolerance).
    out = jax.block_until_ready(actor_forward(state, params))
    assert out.shape == (batch, action_dim)
    assert jnp.allclose(out, ref, atol=5e-2, rtol=5e-2), "bf16 path mismatch vs reference"

    print("KERNEL_OK")
</pallas_src>

<mosaic_0001>
module attributes {stable_mosaic.version = 11 : i64} {
  func.func @actor_kernel(%arg0: i32, %arg1: memref<256x16xf32, #tpu.memory_space<vmem>>, %arg2: memref<64x16xf32, #tpu.memory_space<vmem>>, %arg3: memref<64x1xf32, #tpu.memory_space<vmem>>, %arg4: memref<32x64xf32, #tpu.memory_space<vmem>>, %arg5: memref<32x1xf32, #tpu.memory_space<vmem>>, %arg6: memref<32x32xf32, #tpu.memory_space<vmem>>, %arg7: memref<32x1xf32, #tpu.memory_space<vmem>>, %arg8: memref<32x32xf32, #tpu.memory_space<vmem>>, %arg9: memref<32x1xf32, #tpu.memory_space<vmem>>, %arg10: memref<4x32xf32, #tpu.memory_space<vmem>>, %arg11: memref<4x1xf32, #tpu.memory_space<vmem>>, %arg12: memref<4x256xf32, #tpu.memory_space<vmem>>) attributes {dimension_semantics = [#tpu.dimension_semantics<parallel>], iteration_bounds = array<i64: 1>, scalar_prefetch = 0 : i64, scratch_operands = 0 : i64, tpu.core_type = #tpu.core_type<tc>, window_params = [{transform_indices = @transform_0, window_bounds = array<i64: 256, 16>}, {pipeline_mode = #tpu.pipeline_mode<synchronous>, transform_indices = @transform_1, window_bounds = array<i64: 64, 16>}, {pipeline_mode = #tpu.pipeline_mode<synchronous>, transform_indices = @transform_2, window_bounds = array<i64: 64, 1>}, {pipeline_mode = #tpu.pipeline_mode<synchronous>, transform_indices = @transform_3, window_bounds = array<i64: 32, 64>}, {pipeline_mode = #tpu.pipeline_mode<synchronous>, transform_indices = @transform_4, window_bounds = array<i64: 32, 1>}, {pipeline_mode = #tpu.pipeline_mode<synchronous>, transform_indices = @transform_5, window_bounds = array<i64: 32, 32>}, {pipeline_mode = #tpu.pipeline_mode<synchronous>, transform_indices = @transform_6, window_bounds = array<i64: 32, 1>}, {pipeline_mode = #tpu.pipeline_mode<synchronous>, transform_indices = @transform_7, window_bounds = array<i64: 32, 32>}, {pipeline_mode = #tpu.pipeline_mode<synchronous>, transform_indices = @transform_8, window_bounds = array<i64: 32, 1>}, {pipeline_mode = #tpu.pipeline_mode<synchronous>, transform_indices = @transform_9, window_bounds = array<i64: 4, 32>}, {pipeline_mode = #tpu.pipeline_mode<synchronous>, transform_indices = @transform_10, window_bounds = array<i64: 4, 1>}, {transform_indices = @transform_11, window_bounds = array<i64: 4, 256>}]} {
    %c0 = arith.constant 0 : index
    %c0_0 = arith.constant 0 : index
    %0 = vector.load %arg2[%c0, %c0_0] : memref<64x16xf32, #tpu.memory_space<vmem>>, vector<64x16xf32>
    %c0_1 = arith.constant 0 : index
    %c0_2 = arith.constant 0 : index
    %1 = vector.load %arg1[%c0_1, %c0_2] : memref<256x16xf32, #tpu.memory_space<vmem>>, vector<256x16xf32>
    %cst = arith.constant dense<0.000000e+00> : vector<64x256xf32>
    %2 = tpu.matmul %0, %1, %cst {dimension_numbers = #tpu.dot_dimension_numbers<[1], [1], [0], [0], [0, 0, 1, 0], [], []>} : vector<64x16xf32>, vector<256x16xf32>, vector<64x256xf32> -> vector<64x256xf32>
    %c0_3 = arith.constant 0 : index
    %c0_4 = arith.constant 0 : index
    %3 = vector.load %arg3[%c0_3, %c0_4] : memref<64x1xf32, #tpu.memory_space<vmem>>, vector<64x1xf32>
    %4 = vector.broadcast %3 : vector<64x1xf32> to vector<64x256xf32>
    %5 = arith.addf %2, %4 : vector<64x256xf32>
    %cst_5 = arith.constant 0.000000e+00 : f32
    %6 = vector.broadcast %cst_5 : f32 to vector<64x256xf32>
    %7 = arith.maximumf %5, %6 : vector<64x256xf32>
    %c0_6 = arith.constant 0 : index
    %c0_7 = arith.constant 0 : index
    %8 = vector.load %arg4[%c0_6, %c0_7] : memref<32x64xf32, #tpu.memory_space<vmem>>, vector<32x64xf32>
    %cst_8 = arith.constant dense<0.000000e+00> : vector<32x256xf32>
    %9 = tpu.matmul %8, %7, %cst_8 {dimension_numbers = #tpu.dot_dimension_numbers<[1], [0], [0], [1], [0, 0, 1, 1], [], []>} : vector<32x64xf32>, vector<64x256xf32>, vector<32x256xf32> -> vector<32x256xf32>
    %c0_9 = arith.constant 0 : index
    %c0_10 = arith.constant 0 : index
    %10 = vector.load %arg5[%c0_9, %c0_10] : memref<32x1xf32, #tpu.memory_space<vmem>>, vector<32x1xf32>
    %11 = vector.broadcast %10 : vector<32x1xf32> to vector<32x256xf32>
    %12 = arith.addf %9, %11 : vector<32x256xf32>
    %cst_11 = arith.constant 0.000000e+00 : f32
    %13 = vector.broadcast %cst_11 : f32 to vector<32x256xf32>
    %14 = arith.maximumf %12, %13 : vector<32x256xf32>
    %c0_12 = arith.constant 0 : index
    %c0_13 = arith.constant 0 : index
    %15 = vector.load %arg6[%c0_12, %c0_13] : memref<32x32xf32, #tpu.memory_space<vmem>>, vector<32x32xf32>
    %cst_14 = arith.constant dense<0.000000e+00> : vector<32x256xf32>
    %16 = tpu.matmul %15, %14, %cst_14 {dimension_numbers = #tpu.dot_dimension_numbers<[1], [0], [0], [1], [0, 0, 1, 1], [], []>} : vector<32x32xf32>, vector<32x256xf32>, vector<32x256xf32> -> vector<32x256xf32>
    %c0_15 = arith.constant 0 : index
    %c0_16 = arith.constant 0 : index
    %17 = vector.load %arg7[%c0_15, %c0_16] : memref<32x1xf32, #tpu.memory_space<vmem>>, vector<32x1xf32>
    %18 = vector.broadcast %17 : vector<32x1xf32> to vector<32x256xf32>
    %19 = arith.addf %16, %18 : vector<32x256xf32>
    %cst_17 = arith.constant 0.000000e+00 : f32
    %20 = vector.broadcast %cst_17 : f32 to vector<32x256xf32>
    %21 = arith.maximumf %19, %20 : vector<32x256xf32>
    %c0_18 = arith.constant 0 : index
    %c0_19 = arith.constant 0 : index
    %22 = vector.load %arg8[%c0_18, %c0_19] : memref<32x32xf32, #tpu.memory_space<vmem>>, vector<32x32xf32>
    %cst_20 = arith.constant dense<0.000000e+00> : vector<32x256xf32>
    %23 = tpu.matmul %22, %21, %cst_20 {dimension_numbers = #tpu.dot_dimension_numbers<[1], [0], [0], [1], [0, 0, 1, 1], [], []>} : vector<32x32xf32>, vector<32x256xf32>, vector<32x256xf32> -> vector<32x256xf32>
    %c0_21 = arith.constant 0 : index
    %c0_22 = arith.constant 0 : index
    %24 = vector.load %arg9[%c0_21, %c0_22] : memref<32x1xf32, #tpu.memory_space<vmem>>, vector<32x1xf32>
    %25 = vector.broadcast %24 : vector<32x1xf32> to vector<32x256xf32>
    %26 = arith.addf %23, %25 : vector<32x256xf32>
    %cst_23 = arith.constant 0.000000e+00 : f32
    %27 = vector.broadcast %cst_23 : f32 to vector<32x256xf32>
    %28 = arith.maximumf %26, %27 : vector<32x256xf32>
    %c0_24 = arith.constant 0 : index
    %c0_25 = arith.constant 0 : index
    %29 = vector.load %arg10[%c0_24, %c0_25] : memref<4x32xf32, #tpu.memory_space<vmem>>, vector<4x32xf32>
    %cst_26 = arith.constant dense<0.000000e+00> : vector<4x256xf32>
    %30 = tpu.matmul %29, %28, %cst_26 {dimension_numbers = #tpu.dot_dimension_numbers<[1], [0], [0], [1], [0, 0, 1, 1], [], []>} : vector<4x32xf32>, vector<32x256xf32>, vector<4x256xf32> -> vector<4x256xf32>
    %c0_27 = arith.constant 0 : index
    %c0_28 = arith.constant 0 : index
    %31 = vector.load %arg11[%c0_27, %c0_28] : memref<4x1xf32, #tpu.memory_space<vmem>>, vector<4x1xf32>
    %32 = vector.broadcast %31 : vector<4x1xf32> to vector<4x256xf32>
    %33 = arith.addf %30, %32 : vector<4x256xf32>
    %c0_29 = arith.constant 0 : index
    %c0_30 = arith.constant 0 : index
    %34 = vector.load %arg12[%c0_29, %c0_30] : memref<4x256xf32, #tpu.memory_space<vmem>>, vector<4x256xf32>
    tpu.vector_store %arg12[%c0_29, %c0_30], %33 {strides = array<i32>} : memref<4x256xf32, #tpu.memory_space<vmem>>, vector<4x256xf32>,
    return
  }
  func.func @transform_0(%arg0: i32) -> (i32, i32) {
    %c0_i32 = arith.constant 0 : i32
    %c0_i32_0 = arith.constant 0 : i32
    return %arg0, %c0_i32 : i32, i32
  }
  func.func @transform_1(%arg0: i32) -> (i32, i32) {
    %c0_i32 = arith.constant 0 : i32
    %c0_i32_0 = arith.constant 0 : i32
    %c0_i32_1 = arith.constant 0 : i32
    return %c0_i32, %c0_i32_0 : i32, i32
  }
  func.func @transform_2(%arg0: i32) -> (i32, i32) {
    %c0_i32 = arith.constant 0 : i32
    %c0_i32_0 = arith.constant 0 : i32
    %c0_i32_1 = arith.constant 0 : i32
    return %c0_i32, %c0_i32_0 : i32, i32
  }
  func.func @transform_3(%arg0: i32) -> (i32, i32) {
    %c0_i32 = arith.constant 0 : i32
    %c0_i32_0 = arith.constant 0 : i32
    %c0_i32_1 = arith.constant 0 : i32
    return %c0_i32, %c0_i32_0 : i32, i32
  }
  func.func @transform_4(%arg0: i32) -> (i32, i32) {
    %c0_i32 = arith.constant 0 : i32
    %c0_i32_0 = arith.constant 0 : i32
    %c0_i32_1 = arith.constant 0 : i32
    return %c0_i32, %c0_i32_0 : i32, i32
  }
  func.func @transform_5(%arg0: i32) -> (i32, i32) {
    %c0_i32 = arith.constant 0 : i32
    %c0_i32_0 = arith.constant 0 : i32
    %c0_i32_1 = arith.constant 0 : i32
    return %c0_i32, %c0_i32_0 : i32, i32
  }
  func.func @transform_6(%arg0: i32) -> (i32, i32) {
    %c0_i32 = arith.constant 0 : i32
    %c0_i32_0 = arith.constant 0 : i32
    %c0_i32_1 = arith.constant 0 : i32
    return %c0_i32, %c0_i32_0 : i32, i32
  }
  func.func @transform_7(%arg0: i32) -> (i32, i32) {
    %c0_i32 = arith.constant 0 : i32
    %c0_i32_0 = arith.constant 0 : i32
    %c0_i32_1 = arith.constant 0 : i32
    return %c0_i32, %c0_i32_0 : i32, i32
  }
  func.func @transform_8(%arg0: i32) -> (i32, i32) {
    %c0_i32 = arith.constant 0 : i32
    %c0_i32_0 = arith.constant 0 : i32
    %c0_i32_1 = arith.constant 0 : i32
    return %c0_i32, %c0_i32_0 : i32, i32
  }
  func.func @transform_9(%arg0: i32) -> (i32, i32) {
    %c0_i32 = arith.constant 0 : i32
    %c0_i32_0 = arith.constant 0 : i32
    %c0_i32_1 = arith.constant 0 : i32
    return %c0_i32, %c0_i32_0 : i32, i32
  }
  func.func @transform_10(%arg0: i32) -> (i32, i32) {
    %c0_i32 = arith.constant 0 : i32
    %c0_i32_0 = arith.constant 0 : i32
    %c0_i32_1 = arith.constant 0 : i32
    return %c0_i32, %c0_i32_0 : i32, i32
  }
  func.func @transform_11(%arg0: i32) -> (i32, i32) {
    %c0_i32 = arith.constant 0 : i32
    %c0_i32_0 = arith.constant 0 : i32
    return %c0_i32, %arg0 : i32, i32
  }
}

</mosaic_0001>

<bundles_post_ra>
// kernel: tpu_custom_call.1
= control target key start
LH: loop header
LB: loop body
LE: loop exit
PB: predicated region body
PF: predicated region fallthrough
CT: control target
= control target key end

     0   :  { %vm127_vm0 = vcmask 130048   ;;  %v1018_v3 = vmov 0   ;;  %s1380_s0 = inlined_call_operand.vmem [shape: f32[256,16], index: 0, kind: input, shape index: {}]   ;;  %s1381_s1 = inlined_call_operand.vmem [shape: f32[64,16], index: 1, kind: input, shape index: {}]   ;;  %s1382_s2 = inlined_call_operand.vmem [shape: f32[64,1], index: 2, kind: input, shape index: {}]   ;;  %s1383_s3 = inlined_call_operand.vmem [shape: f32[32,64], index: 3, kind: input, shape index: {}]   ;;  %s1384_s4 = inlined_call_operand.vmem [shape: f32[32,1], index: 4, kind: input, shape index: {}]   ;;  %s1385_s5 = inlined_call_operand.vmem [shape: f32[32,32], index: 5, kind: input, shape index: {}]   ;;  %s1386_s6 = inlined_call_operand.vmem [shape: f32[32,1], index: 6, kind: input, shape index: {}]   ;;  %s1387_s7 = inlined_call_operand.vmem [shape: f32[32,32], index: 7, kind: input, shape index: {}]   ;;  %s1388_s8 = inlined_call_operand.vmem [shape: f32[32,1], index: 8, kind: input, shape index: {}]   ;;  %s1389_s9 = inlined_call_operand.vmem [shape: f32[4,32], index: 9, kind: input, shape index: {}]   ;;  %s1390_s10 = inlined_call_operand.vmem [shape: f32[4,1], index: 10, kind: input, shape index: {}]   ;;  %s1391_s11 = inlined_call_operand.hbm [shape: f32[4,256], index: 11, kind: output, shape index: {}]  }
   0x1   :  { %v78_v0 = vld [vmem:[%s1380_s0 + $0xf8] sm:$0xff]  ;;  %v77_v2 = vld [vmem:[%s1380_s0 + $0xf0] sm:$0xff]  ;;  %995 = vset.pattern.permute.xlu1 %v1018_v3  ;;  %994 = vset.pattern.permute.xlu0 %v1018_v3  ;;  %v76_v5 = vld [vmem:[%s1380_s0 + $0xe8] sm:$0xff] }
   0x2   :  { %v62_v1 = vld [vmem:[%s1380_s0 + $0x78] sm:$0xff]  ;;  %943 = vmatprep.subr.msk.mxu0 %vm127_vm0, %v78_v0  ;;  %v61_v4 = vld [vmem:[%s1380_s0 + $0x70] sm:$0xff]  ;;  %v60_v6 = vld [vmem:[%s1380_s0 + $0x68] sm:$0xff] }
   0x3   :  { %944 = vmatpush3.xpose.msk.msra.mxu0 %vm127_vm0, %v62_v1  ;;  %v75_v7 = vld [vmem:[%s1380_s0 + $0xe0] sm:$0xff]  ;;  %v74_v10 = vld [vmem:[%s1380_s0 + $0xd8] sm:$0xff]  ;;  %v84_v12 = vld [vmem:[%s1382_s2 + $0x28] sm:$0xff] }
   0x4   :  { %945 = vmatprep.subr.msk.mxu0 %vm127_vm0, %v77_v2  ;;  %v1111_v8 = vld [vmem:[%s1381_s1] sm:$0xff]  ;;  %v86_v11 = vld [vmem:[%s1382_s2 + $0x38] sm:$0xff]  ;;  %114 = vperm.xlu1 %995, %v84_v12   ;;  %v85_v14 = vld [vmem:[%s1382_s2 + $0x30] sm:$0xff] }
   0x5   :  { %v59_v9 = vld [vmem:[%s1380_s0 + $0x60] sm:$0xff]  ;;  %975 = vmatprep.mubr.msk.f32.mxu0 %vm127_vm0, %v1111_v8  ;;  %124 = vperm.xlu0 %994, %v86_v11   ;;  %v58_v13 = vld [vmem:[%s1380_s0 + $0x58] sm:$0xff]  ;;  %v73_v15 = vld [vmem:[%s1380_s0 + $0xd0] sm:$0xff] }
   0x6   :  { %v83_v16 = vld [vmem:[%s1382_s2 + $0x20] sm:$0xff]  ;;  %v57_v17 = vld [vmem:[%s1380_s0 + $0x50] sm:$0xff]  ;;  %v82_v18 = vld [vmem:[%s1382_s2 + $0x18] sm:$0xff] }
   0x7   :  { %946 = vmatpush3.xpose.msk.msra.mxu0 %vm127_vm0, %v61_v4  ;;  %v72_v19 = vld [vmem:[%s1380_s0 + $0xc8] sm:$0xff]  ;;  %v81_v20 = vld [vmem:[%s1382_s2 + $0x10] sm:$0xff] }
   0x8   :  { %947 = vmatprep.subr.msk.mxu0 %vm127_vm0, %v76_v5  ;;  %109 = vperm.xlu1 %995, %v83_v16  }
   0x9   :  { %119 = vperm.xlu0 %994, %v85_v14  }
   0xb   :  { %948 = vmatpush3.xpose.msk.msra.mxu0 %vm127_vm0, %v60_v6 }
   0xc   :  { %949 = vmatprep.subr.msk.mxu0 %vm127_vm0, %v75_v7 }
   0xf   :  { %950 = vmatpush3.xpose.msk.msra.mxu0 %vm127_vm0, %v59_v9 }
  0x10   :  { %951 = vmatprep.subr.msk.mxu0 %vm127_vm0, %v74_v10 }
  0x13   :  { %952 = vmatpush3.xpose.msk.msra.mxu0 %vm127_vm0, %v58_v13 }
  0x14   :  { %953 = vmatprep.subr.msk.mxu0 %vm127_vm0, %v73_v15 }
  0x15   :  { %16 = vsyncpa [#allocation3], 0  ;;  %104 = vperm.xlu0 %994, %v82_v18   ;;  %v56_v21 = vld [vmem:[%s1380_s0 + $0x48] sm:$0xff]  ;;  %99 = vperm.xlu1 %995, %v81_v20   ;;  %v71_v23 = vld [vmem:[%s1380_s0 + $0xc0] sm:$0xff]  ;;  %v1019_v62 = vmov 0.0   ;;  %vm405_vm1 = vcmask 523264  }
  0x16   :  { %v80_v22 = vld [vmem:[%s1382_s2 + $0x8] sm:$0xff]  ;;  %v79_v24 = vld [vmem:[%s1382_s2] sm:$0xff]  ;;  %v384_v26 = vld [vmem:[%s1384_s4 + $0x18] sm:$0xff]  ;;  %482 = vmatprep.mubr.f32.mxu1 %v1019_v62  ;;  %vm543_vm2 = vcmask 261120   ;;  %s1020_s30 = smov [#allocation2]  }
  0x17   :  { %954 = vmatpush3.xpose.msk.msra.mxu0 %vm127_vm0, %v57_v17  ;;  %v55_v25 = vld [vmem:[%s1380_s0 + $0x40] sm:$0xff]  ;;  %v70_v27 = vld [vmem:[%s1380_s0 + $0xb8] sm:$0xff]  ;;  %v383_v28 = vld [vmem:[%s1384_s4 + $0x10] sm:$0xff]  ;;  %s882_s12 = sshll.u32 %s1020_s30, 4  ;;  %s883_s12 = int_to_ptr.vmem [resolvable:$true] %s882_s12 }
  0x18   :  { %955 = vmatprep.subr.msk.mxu0 %vm127_vm0, %v72_v19  ;;  %v54_v29 = vld [vmem:[%s1380_s0 + $0x38] sm:$0xff]  ;;  %v382_v30 = vld [vmem:[%s1384_s4 + $0x8] sm:$0xff]  ;;  %v69_v31 = vld [vmem:[%s1380_s0 + $0xb0] sm:$0xff]  ;;  %s996_s13 = scalar_lea.vmem %s883_s12, 128  ;;  %p1001_p1 = scmp.lt.s32.totalorder %s883_s12, %s883_s12 }
  0x19   :  { %94 = vperm.xlu0 %994, %v80_v22   ;;  %89 = vperm.xlu1 %995, %v79_v24   ;;  %v381_v32 = vld [vmem:[%s1384_s4] sm:$0xff]  ;;  %v53_v33 = vld [vmem:[%s1380_s0 + $0x30] sm:$0xff]  ;;  %v522_v34 = vld [vmem:[%s1386_s6 + $0x18] sm:$0xff]  ;;  %p997_p0 = scmp.ne.s32.totalorder %s883_s12, %s996_s13  ;;  %p1002_p2 = scmp.lt.s32.totalorder %s996_s13, %s996_s13 }
  0x1a   :  { %v68_v35 = vld [vmem:[%s1380_s0 + $0xa8] sm:$0xff]  ;;  %v521_v36 = vld [vmem:[%s1386_s6 + $0x10] sm:$0xff]  ;;  %v67_v39 = vld [vmem:[%s1380_s0 + $0xa0] sm:$0xff] }
  0x1b   :  { %956 = vmatpush3.xpose.msk.msra.mxu0 %vm127_vm0, %v56_v21  ;;  %v52_v37 = vld [vmem:[%s1380_s0 + $0x28] sm:$0xff]  ;;  %v519_v40 = vld [vmem:[%s1386_s6] sm:$0xff]  ;;  %v660_v42 = vld [vmem:[%s1388_s8 + $0x18] sm:$0xff]  ;;  %p1003_p3 = por %p1002_p2, %p1001_p1 }
  0x1c   :  { %957 = vmatprep.subr.msk.mxu0 %vm127_vm0, %v71_v23  ;;  %v520_v38 = vld [vmem:[%s1386_s6 + $0x8] sm:$0xff]  ;;  %v51_v41 = vld [vmem:[%s1380_s0 + $0x20] sm:$0xff]  ;;  %v66_v43 = vld [vmem:[%s1380_s0 + $0x98] sm:$0xff] }
  0x1d   :  { %402 = vperm.xlu0 %994, %v384_v26   ;;  %397 = vperm.xlu1 %995, %v383_v28   ;;  %v659_v44 = vld [vmem:[%s1388_s8 + $0x10] sm:$0xff]  ;;  %v50_v45 = vld [vmem:[%s1380_s0 + $0x18] sm:$0xff]  ;;  %v658_v46 = vld [vmem:[%s1388_s8 + $0x8] sm:$0xff]  ;;  %p1004_p4 = pnand %p1003_p3, %p997_p0 }
  0x1e   :  { %v65_v47 = vld [vmem:[%s1380_s0 + $0x90] sm:$0xff]  ;;  %v657_v48 = vld [vmem:[%s1388_s8] sm:$0xff]  ;;  %v64_v51 = vld [vmem:[%s1380_s0 + $0x88] sm:$0xff] }
  0x1f   :  { %958 = vmatpush3.xpose.msk.msra.mxu0 %vm127_vm0, %v55_v25  ;;  %v49_v49 = vld [vmem:[%s1380_s0 + $0x10] sm:$0xff]  ;;  %v791_v50 = vld [vmem:[%s1390_s10] sm:$0xf]  ;;  %v48_v52 = vld [vmem:[%s1380_s0 + $0x8] sm:$0xff] }
  0x20   :  { %959 = vmatprep.subr.msk.mxu0 %vm127_vm0, %v70_v27  ;;  %v63_v53 = vld [vmem:[%s1380_s0 + $0x80] sm:$0xff]  ;;  %v40_v55 = vld [vmem:[%s1381_s1 + $0x8] sm:$0xff]  ;;  %v41_v56 = vld [vmem:[%s1381_s1 + $0x10] sm:$0xff] }
  0x21   :  { %392 = vperm.xlu0 %994, %v382_v30   ;;  %387 = vperm.xlu1 %995, %v381_v32   ;;  %v47_v54 = vld [vmem:[%s1380_s0] sm:$0xff]  ;;  %v42_v57 = vld [vmem:[%s1381_s1 + $0x18] sm:$0xff]  ;;  %v44_v59 = vld [vmem:[%s1381_s1 + $0x28] sm:$0xff] }
  0x22   :  { %v43_v58 = vld [vmem:[%s1381_s1 + $0x20] sm:$0xff]  ;;  %v45_v60 = vld [vmem:[%s1381_s1 + $0x30] sm:$0xff]  ;;  %v46_v61 = vld [vmem:[%s1381_s1 + $0x38] sm:$0xff] }
  0x23   :  { %960 = vmatpush3.xpose.msk.msra.mxu0 %vm127_vm0, %v54_v29 }
  0x24   :  { %961 = vmatprep.subr.msk.mxu0 %vm127_vm0, %v69_v31 }
  0x25   :  { %540 = vperm.xlu0 %994, %v522_v34   ;;  %535 = vperm.xlu1 %995, %v521_v36  }
  0x27   :  { %962 = vmatpush3.xpose.msk.msra.mxu0 %vm127_vm0, %v53_v33 }
  0x28   :  { %963 = vmatprep.subr.msk.mxu0 %vm127_vm0, %v68_v35 }
  0x29   :  { %530 = vperm.xlu0 %994, %v520_v38   ;;  %525 = vperm.xlu1 %995, %v519_v40  }
  0x2b   :  { %964 = vmatpush3.xpose.msk.msra.mxu0 %vm127_vm0, %v52_v37 }
  0x2c   :  { %965 = vmatprep.subr.msk.mxu0 %vm127_vm0, %v67_v39 }
  0x2d   :  { %678 = vperm.xlu0 %994, %v660_v42   ;;  %673 = vperm.xlu1 %995, %v659_v44  }
  0x2f   :  { %966 = vmatpush3.xpose.msk.msra.mxu0 %vm127_vm0, %v51_v41 }
  0x30   :  { %967 = vmatprep.subr.msk.mxu0 %vm127_vm0, %v66_v43 }
  0x31   :  { %668 = vperm.xlu0 %994, %v658_v46   ;;  %663 = vperm.xlu1 %995, %v657_v48  }
  0x33   :  { %968 = vmatpush3.xpose.msk.msra.mxu0 %vm127_vm0, %v50_v45 }
  0x34   :  { %969 = vmatprep.subr.msk.mxu0 %vm127_vm0, %v65_v47 }
  0x35   :  { %794 = vperm.xlu0 %994, %v791_v50  }
  0x37   :  { %970 = vmatpush3.xpose.msk.msra.mxu0 %vm127_vm0, %v49_v49 }
  0x38   :  { %971 = vmatprep.subr.msk.mxu0 %vm127_vm0, %v64_v51 }
  0x3b   :  { %972 = vmatpush3.xpose.msk.msra.mxu0 %vm127_vm0, %v48_v52 }
  0x3c   :  { %973 = vmatprep.subr.msk.mxu0 %vm127_vm0, %v63_v53 }
  0x3f   :  { %974 = vmatpush3.xpose.msk.msra.mxu0 %vm127_vm0, %v47_v54 }
  0x42   :  { %976 = vmatmul.mubr.msk.f32.vlgmr.msra.gmra.mxu0 %vm127_vm0, %v1111_v8 }
  0x43   :  { %977 = vmatprep.mubr.msk.f32.mxu0 %vm127_vm0, %v40_v55 }
  0x46   :  { %978 = vmatmul.mubr.msk.f32.gmra.mxu0 %vm127_vm0, %v40_v55  ;;  %v377_v55 = vld [vmem:[%s1383_s3] sm:$0xff] }
  0x47   :  { %979 = vmatprep.mubr.msk.f32.mxu0 %vm127_vm0, %v41_v56 }
  0x4a   :  { %980 = vmatmul.mubr.msk.f32.gmra.mxu0 %vm127_vm0, %v41_v56  ;;  %v378_v56 = vld [vmem:[%s1383_s3 + $0x8] sm:$0xff] }
  0x4b   :  { %981 = vmatprep.mubr.msk.f32.mxu0 %vm127_vm0, %v42_v57 }
  0x4e   :  { %982 = vmatmul.mubr.msk.f32.gmra.mxu0 %vm127_vm0, %v42_v57  ;;  %v379_v57 = vld [vmem:[%s1383_s3 + $0x10] sm:$0xff] }
  0x4f   :  { %983 = vmatprep.mubr.msk.f32.mxu0 %vm127_vm0, %v43_v58 }
  0x52   :  { %984 = vmatmul.mubr.msk.f32.gmra.mxu0 %vm127_vm0, %v43_v58  ;;  %v380_v58 = vld [vmem:[%s1383_s3 + $0x18] sm:$0xff] }
  0x53   :  { %985 = vmatprep.mubr.msk.f32.mxu0 %vm127_vm0, %v44_v59 }
  0x56   :  { %986 = vmatmul.mubr.msk.f32.gmra.mxu0 %vm127_vm0, %v44_v59 }
  0x57   :  { %987 = vmatprep.mubr.msk.f32.mxu0 %vm127_vm0, %v45_v60 }
  0x5a   :  { %988 = vmatmul.mubr.msk.f32.gmra.mxu0 %vm127_vm0, %v45_v60 }
  0x5b   :  { %989 = vmatprep.mubr.msk.f32.mxu0 %vm127_vm0, %v46_v61 }
  0x5e   :  { %990 = vmatmul.mubr.msk.f32.gmra.mxu0 %vm127_vm0, %v46_v61 }
  0x7f   :  { %v115_v12 = vpop.permute.xlu1 %114 }
  0x80   :  { %v125_v10 = vpop.permute.xlu0 %124 }
  0x83   :  { %v110_v17 = vpop.permute.xlu1 %109 }
  0x84   :  { %v120_v15 = vpop.permute.xlu0 %119 }
  0x90   :  { %v105_v25 = vpop.permute.xlu0 %104  ;;  %v100_v28 = vpop.permute.xlu1 %99 }
  0x94   :  { %v95_v39 = vpop.permute.xlu0 %94  ;;  %v90_v42 = vpop.permute.xlu1 %89 }
 0x102   :  { %v314_v63 = vpop.f32.mrf.mxu0 }
 0x103   :  { %v315_v49 = vadd.f32 %v314_v63, %v90_v42 }
 0x104   :  { %v316_v0 = vpop.f32.mrf.mxu0 }
 0x105   :  { %v317_v47 = vadd.f32 %v316_v0, %v90_v42  ;;  %v361_v54 = vmax.f32 %v315_v49, 0.0 }
 0x106   :  { %v320_v1 = vpop.f32.mrf.mxu0 }
 0x107   :  { %v321_v45 = vadd.f32 %v320_v1, %v95_v39  ;;  %v362_v53 = vmax.f32 %v317_v47, 0.0  ;;  %v403_v1 = vpop.permute.xlu0 %402 }
 0x108   :  { %v322_v2 = vpop.f32.mrf.mxu0 }
 0x109   :  { %v323_v43 = vadd.f32 %v322_v2, %v95_v39  ;;  %v363_v52 = vmax.f32 %v321_v45, 0.0 }
 0x10a   :  { %v326_v3 = vpop.f32.mrf.mxu0 }
 0x10b   :  { %v327_v40 = vadd.f32 %v326_v3, %v100_v28  ;;  %v364_v51 = vmax.f32 %v323_v43, 0.0  ;;  %v398_v3 = vpop.permute.xlu1 %397 }
 0x10c   :  { %v328_v4 = vpop.f32.mrf.mxu0 }
 0x10d   :  { %v329_v37 = vadd.f32 %v328_v4, %v100_v28  ;;  %v365_v50 = vmax.f32 %v327_v40, 0.0 }
 0x10e   :  { %v332_v5 = vpop.f32.mrf.mxu0 }
 0x10f   :  { %v333_v35 = vadd.f32 %v332_v5, %v105_v25  ;;  %v366_v48 = vmax.f32 %v329_v37, 0.0 }
 0x110   :  { %v334_v6 = vpop.f32.mrf.mxu0 }
 0x111   :  { %v335_v33 = vadd.f32 %v334_v6, %v105_v25  ;;  %v367_v46 = vmax.f32 %v333_v35, 0.0  ;;  %v516_v25 = vld [vmem:[%s1385_s5 + $0x8] sm:$0xff] }
 0x112   :  { %v338_v7 = vpop.f32.mrf.mxu0 }
 0x113   :  { %v339_v31 = vadd.f32 %v338_v7, %v110_v17  ;;  %v368_v44 = vmax.f32 %v335_v33, 0.0 }
 0x114   :  { %v340_v8 = vpop.f32.mrf.mxu0 }
 0x115   :  { %v341_v29 = vadd.f32 %v340_v8, %v110_v17  ;;  %v369_v41 = vmax.f32 %v339_v31, 0.0 }
 0x116   :  { %v344_v9 = vpop.f32.mrf.mxu0 }
 0x117   :  { %v345_v26 = vadd.f32 %v344_v9, %v115_v12  ;;  %v370_v38 = vmax.f32 %v341_v29, 0.0  ;;  %v393_v9 = vpop.permute.xlu0 %392 }
 0x118   :  { %v346_v11 = vpop.f32.mrf.mxu0 }
 0x119   :  { %v347_v23 = vadd.f32 %v346_v11, %v115_v12  ;;  %v371_v36 = vmax.f32 %v345_v26, 0.0  ;;  %v517_v26 = vld [vmem:[%s1385_s5 + $0x10] sm:$0xff] }
 0x11a   :  { %v350_v13 = vpop.f32.mrf.mxu0 }
 0x11b   :  { %v351_v22 = vadd.f32 %v350_v13, %v120_v15  ;;  %v372_v34 = vmax.f32 %v347_v23, 0.0  ;;  %v388_v13 = vpop.permute.xlu1 %387  ;;  %v541_v33 = vpop.permute.xlu0 %540 }
 0x11c   :  { %v352_v14 = vpop.f32.mrf.mxu0 }
 0x11d   :  { %v353_v20 = vadd.f32 %v352_v14, %v120_v15  ;;  %v373_v32 = vmax.f32 %v351_v22, 0.0 }
 0x11e   :  { %v356_v16 = vpop.f32.mrf.mxu0 }
 0x11f   :  { %v357_v18 = vadd.f32 %v356_v16, %v125_v10  ;;  %v374_v30 = vmax.f32 %v353_v20, 0.0  ;;  %v536_v35 = vpop.permute.xlu1 %535 }
 0x120   :  { %v358_v19 = vpop.f32.mrf.mxu0 }
 0x121   :  { %v359_v21 = vadd.f32 %v358_v19, %v125_v10  ;;  %v375_v27 = vmax.f32 %v357_v18, 0.0 }
 0x123   :  { %v376_v24 = vmax.f32 %v359_v21, 0.0  ;;  %v526_v45 = vpop.permute.xlu1 %525 }
 0x125   :  { %434 = vmatprep.subr.mxu1 %v376_v24  ;;  %v515_v24 = vld [vmem:[%s1385_s5] sm:$0xff] }
 0x126   :  { %435 = vmatpush1.msra.mxu1 %v375_v27  ;;  %v518_v27 = vld [vmem:[%s1385_s5 + $0x18] sm:$0xff] }
 0x127   :  { %436 = vmatprep.subr.mxu1 %v374_v30 }
 0x128   :  { %437 = vmatpush1.msra.mxu1 %v373_v32 }
 0x129   :  { %438 = vmatprep.subr.mxu1 %v372_v34 }
 0x12a   :  { %439 = vmatpush1.msra.mxu1 %v371_v36 }
 0x12b   :  { %440 = vmatprep.subr.mxu1 %v370_v38 }
 0x12c   :  { %441 = vmatpush1.msra.mxu1 %v369_v41  ;;  %v531_v41 = vpop.permute.xlu0 %530 }
 0x12d   :  { %442 = vmatprep.subr.mxu1 %v368_v44 }
 0x12e   :  { %443 = vmatpush1.msra.mxu1 %v367_v46 }
 0x12f   :  { %444 = vmatprep.subr.mxu1 %v366_v48 }
 0x130   :  { %445 = vmatpush1.msra.mxu1 %v365_v50 }
 0x131   :  { %446 = vmatprep.subr.mxu1 %v364_v51 }
 0x132   :  { %447 = vmatpush1.msra.mxu1 %v363_v52 }
 0x133   :  { %448 = vmatprep.subr.mxu1 %v362_v53 }
 0x134   :  { %449 = vmatpush1.msra.mxu1 %v361_v54 }
 0x135   :  { %930 = vmatmul.mubr.msk.f32.vlgmr.msra.gmra.mxu1 %vm405_vm1, %v377_v55 }
 0x136   :  { %488 = vmatprep.mubr.f32.mxu1 %v1019_v62 }
 0x139   :  { %931 = vmatmul.mubr.msk.f32.gmra.mxu1 %vm405_vm1, %v378_v56  ;;  %v653_v56 = vld [vmem:[%s1387_s7] sm:$0xff] }
 0x13a   :  { %494 = vmatprep.mubr.f32.mxu1 %v1019_v62 }
 0x13d   :  { %932 = vmatmul.mubr.msk.f32.gmra.mxu1 %vm405_vm1, %v379_v57  ;;  %v654_v57 = vld [vmem:[%s1387_s7 + $0x8] sm:$0xff] }
 0x13e   :  { %500 = vmatprep.mubr.f32.mxu1 %v1019_v62 }
 0x141   :  { %933 = vmatmul.mubr.msk.f32.gmra.mxu1 %vm405_vm1, %v380_v58  ;;  %v655_v58 = vld [vmem:[%s1387_s7 + $0x10] sm:$0xff] }
 0x142   :  { %620 = vmatprep.mubr.f32.mxu1 %v1019_v62 }
 0x1f5   :  { %v484_v59 = vpop.f32.mrf.mxu1 }
 0x1f6   :  { %v485_v18 = vadd.f32 %v484_v59, %v388_v13  ;;  %v656_v59 = vld [vmem:[%s1387_s7 + $0x18] sm:$0xff] }
 0x1f7   :  { %v486_v60 = vpop.f32.mrf.mxu1 }
 0x1f8   :  { %v487_v16 = vadd.f32 %v486_v60, %v388_v13  ;;  %v507_v23 = vmax.f32 %v485_v18, 0.0 }
 0x1f9   :  { %v490_v61 = vpop.f32.mrf.mxu1 }
 0x1fa   :  { %v491_v14 = vadd.f32 %v490_v61, %v393_v9  ;;  %v508_v22 = vmax.f32 %v487_v16, 0.0 }
 0x1fb   :  { %v492_v63 = vpop.f32.mrf.mxu1 }
 0x1fc   :  { %v493_v11 = vadd.f32 %v492_v63, %v393_v9  ;;  %v509_v21 = vmax.f32 %v491_v14, 0.0 }
 0x1fd   :  { %v496_v0 = vpop.f32.mrf.mxu1 }
 0x1fe   :  { %v497_v10 = vadd.f32 %v496_v0, %v398_v3  ;;  %v510_v20 = vmax.f32 %v493_v11, 0.0 }
 0x1ff   :  { %v498_v2 = vpop.f32.mrf.mxu1 }
 0x200   :  { %v499_v7 = vadd.f32 %v498_v2, %v398_v3  ;;  %v511_v19 = vmax.f32 %v497_v10, 0.0  ;;  %v679_v2 = vpop.permute.xlu0 %678 }
 0x201   :  { %v502_v4 = vpop.f32.mrf.mxu1 }
 0x202   :  { %v503_v5 = vadd.f32 %v502_v4, %v403_v1  ;;  %v512_v17 = vmax.f32 %v499_v7, 0.0  ;;  %v674_v4 = vpop.permute.xlu1 %673 }
 0x203   :  { %v504_v6 = vpop.f32.mrf.mxu1 }
 0x204   :  { %v505_v8 = vadd.f32 %v504_v6, %v403_v1  ;;  %v513_v15 = vmax.f32 %v503_v5, 0.0  ;;  %v669_v10 = vpop.permute.xlu0 %668 }
 0x206   :  { %v514_v12 = vmax.f32 %v505_v8, 0.0  ;;  %v664_v14 = vpop.permute.xlu1 %663 }
 0x208   :  { %580 = vmatprep.subr.mxu1 %v514_v12 }
 0x209   :  { %581 = vmatpush1.msra.mxu1 %v513_v15 }
 0x20a   :  { %582 = vmatprep.subr.mxu1 %v512_v17 }
 0x20b   :  { %583 = vmatpush1.msra.mxu1 %v511_v19 }
 0x20c   :  { %584 = vmatprep.subr.mxu1 %v510_v20 }
 0x20d   :  { %585 = vmatpush1.msra.mxu1 %v509_v21 }
 0x20e   :  { %586 = vmatprep.subr.mxu1 %v508_v22 }
 0x20f   :  { %587 = vmatpush1.msra.mxu1 %v507_v23 }
 0x210   :  { %934 = vmatmul.mubr.msk.f32.vlgmr.msra.gmra.mxu1 %vm543_vm2, %v515_v24  ;;  %v790_v24 = vld [vmem:[%s1389_s9] sm:$0xf] }
 0x211   :  { %626 = vmatprep.mubr.f32.mxu1 %v1019_v62 }
 0x214   :  { %935 = vmatmul.mubr.msk.f32.gmra.mxu1 %vm543_vm2, %v516_v25 }
 0x215   :  { %632 = vmatprep.mubr.f32.mxu1 %v1019_v62 }
 0x218   :  { %936 = vmatmul.mubr.msk.f32.gmra.mxu1 %vm543_vm2, %v517_v26  ;;  %v795_v26 = vpop.permute.xlu0 %794 }
 0x219   :  { %638 = vmatprep.mubr.f32.mxu1 %v1019_v62 }
 0x21c   :  { %937 = vmatmul.mubr.msk.f32.gmra.mxu1 %vm543_vm2, %v518_v27 }
 0x21d   :  { %757 = vmatprep.mubr.f32.mxu1 %v1019_v62 }
 0x2d0   :  { %v622_v28 = vpop.f32.mrf.mxu1 }
 0x2d1   :  { %v623_v50 = vadd.f32 %v622_v28, %v526_v45 }
 0x2d2   :  { %v624_v29 = vpop.f32.mrf.mxu1 }
 0x2d3   :  { %v625_v48 = vadd.f32 %v624_v29, %v526_v45  ;;  %v645_v55 = vmax.f32 %v623_v50, 0.0 }
 0x2d4   :  { %v628_v30 = vpop.f32.mrf.mxu1 }
 0x2d5   :  { %v629_v46 = vadd.f32 %v628_v30, %v531_v41  ;;  %v646_v54 = vmax.f32 %v625_v48, 0.0 }
 0x2d6   :  { %v630_v31 = vpop.f32.mrf.mxu1 }
 0x2d7   :  { %v631_v43 = vadd.f32 %v630_v31, %v531_v41  ;;  %v647_v53 = vmax.f32 %v629_v46, 0.0 }
 0x2d8   :  { %v634_v32 = vpop.f32.mrf.mxu1 }
 0x2d9   :  { %v635_v42 = vadd.f32 %v634_v32, %v536_v35  ;;  %v648_v52 = vmax.f32 %v631_v43, 0.0 }
 0x2da   :  { %v636_v34 = vpop.f32.mrf.mxu1 }
 0x2db   :  { %v637_v39 = vadd.f32 %v636_v34, %v536_v35  ;;  %v649_v51 = vmax.f32 %v635_v42, 0.0 }
 0x2dc   :  { %v640_v36 = vpop.f32.mrf.mxu1 }
 0x2dd   :  { %v641_v37 = vadd.f32 %v640_v36, %v541_v33  ;;  %v650_v49 = vmax.f32 %v637_v39, 0.0 }
 0x2de   :  { %v642_v38 = vpop.f32.mrf.mxu1 }
 0x2df   :  { %v643_v40 = vadd.f32 %v642_v38, %v541_v33  ;;  %v651_v47 = vmax.f32 %v641_v37, 0.0 }
 0x2e1   :  { %v652_v44 = vmax.f32 %v643_v40, 0.0 }
 0x2e3   :  { %717 = vmatprep.subr.mxu1 %v652_v44 }
 0x2e4   :  { %718 = vmatpush1.msra.mxu1 %v651_v47 }
 0x2e5   :  { %719 = vmatprep.subr.mxu1 %v650_v49 }
 0x2e6   :  { %720 = vmatpush1.msra.mxu1 %v649_v51 }
 0x2e7   :  { %721 = vmatprep.subr.mxu1 %v648_v52 }
 0x2e8   :  { %722 = vmatpush1.msra.mxu1 %v647_v53 }
 0x2e9   :  { %723 = vmatprep.subr.mxu1 %v646_v54 }
 0x2ea   :  { %724 = vmatpush1.msra.mxu1 %v645_v55 }
 0x2eb   :  { %938 = vmatmul.mubr.msk.f32.vlgmr.msra.gmra.mxu1 %vm543_vm2, %v653_v56 }
 0x2ec   :  { %763 = vmatprep.mubr.f32.mxu1 %v1019_v62 }
 0x2ef   :  { %939 = vmatmul.mubr.msk.f32.gmra.mxu1 %vm543_vm2, %v654_v57 }
 0x2f0   :  { %769 = vmatprep.mubr.f32.mxu1 %v1019_v62 }
 0x2f3   :  { %940 = vmatmul.mubr.msk.f32.gmra.mxu1 %vm543_vm2, %v655_v58 }
 0x2f4   :  { %775 = vmatprep.mubr.f32.mxu1 %v1019_v62 }
 0x2f7   :  { %941 = vmatmul.mubr.msk.f32.gmra.mxu1 %vm543_vm2, %v656_v59 }
 0x2f8   :  { %864 = vmatprep.mubr.f32.mxu1 %v1019_v62 }
 0x3ab   :  { %v759_v60 = vpop.f32.mrf.mxu1 }
 0x3ac   :  { %v760_v18 = vadd.f32 %v759_v60, %v664_v14 }
 0x3ad   :  { %v761_v61 = vpop.f32.mrf.mxu1 }
 0x3ae   :  { %v762_v16 = vadd.f32 %v761_v61, %v664_v14  ;;  %v782_v23 = vmax.f32 %v760_v18, 0.0 }
 0x3af   :  { %v765_v63 = vpop.f32.mrf.mxu1 }
 0x3b0   :  { %v766_v15 = vadd.f32 %v765_v63, %v669_v10  ;;  %v783_v22 = vmax.f32 %v762_v16, 0.0 }
 0x3b1   :  { %v767_v0 = vpop.f32.mrf.mxu1 }
 0x3b2   :  { %v768_v12 = vadd.f32 %v767_v0, %v669_v10  ;;  %v784_v21 = vmax.f32 %v766_v15, 0.0 }
 0x3b3   :  { %v771_v1 = vpop.f32.mrf.mxu1 }
 0x3b4   :  { %v772_v11 = vadd.f32 %v771_v1, %v674_v4  ;;  %v785_v20 = vmax.f32 %v768_v12, 0.0 }
 0x3b5   :  { %v773_v3 = vpop.f32.mrf.mxu1 }
 0x3b6   :  { %v774_v8 = vadd.f32 %v773_v3, %v674_v4  ;;  %v786_v19 = vmax.f32 %v772_v11, 0.0 }
 0x3b7   :  { %v777_v5 = vpop.f32.mrf.mxu1 }
 0x3b8   :  { %v778_v6 = vadd.f32 %v777_v5, %v679_v2  ;;  %v787_v17 = vmax.f32 %v774_v8, 0.0 }
 0x3b9   :  { %v779_v7 = vpop.f32.mrf.mxu1 }
 0x3ba   :  { %v780_v9 = vadd.f32 %v779_v7, %v679_v2  ;;  %v788_v62 = vmax.f32 %v778_v6, 0.0 }
 0x3bc   :  { %v789_v13 = vmax.f32 %v780_v9, 0.0 }
 0x3be   :  { %824 = vmatprep.subr.mxu1 %v789_v13 }
 0x3bf   :  { %825 = vmatpush1.msra.mxu1 %v788_v62 }
 0x3c0   :  { %826 = vmatprep.subr.mxu1 %v787_v17 }
 0x3c1   :  { %827 = vmatpush1.msra.mxu1 %v786_v19 }
 0x3c2   :  { %828 = vmatprep.subr.mxu1 %v785_v20 }
 0x3c3   :  { %829 = vmatpush1.msra.mxu1 %v784_v21 }
 0x3c4   :  { %830 = vmatprep.subr.mxu1 %v783_v22 }
 0x3c5   :  { %831 = vmatpush1.msra.mxu1 %v782_v23 }
 0x3c6   :  { %942 = vmatmul.mubr.msk.f32.vlgmr.msra.gmra.mxu1 %vm543_vm2, %v790_v24 }
 0x486   :  { %v866_v25 = vpop.f32.mrf.mxu1 }
 0x487   :  { %v867_v28 = vadd.f32 %v866_v25, %v795_v26 }
 0x488   :  { %v868_v27 = vpop.f32.mrf.mxu1 }
 0x489   :  { %v869_v29 = vadd.f32 %v868_v27, %v795_v26 }
 0x48b   :  { %v873_v30 = vcombine.low %v867_v28, %v869_v29 }
 0x48d   :  { %875 = vst [vmem:[#allocation2] sm:$0xff] %v873_v30 }
 0x48e   :  { %1007 = shalt.err (!%p1004_p4)
}
 0x48f   :  { %885 = dma.vmem_to_hbm [thread:$0]  %s883_s12, 128, %s1391_s11, [#allocation3]  }
 0x490   :  { %1016 = dma.done.wait [#allocation3], 128  }
 0x491   :  { %1017 = vsyncadd [#allocation3], 4294967168 }
 0x492   :  { %889 = vsyncpa [#allocation3], 1 }

</bundles_post_ra>
